<compile_context>
chip_gen: v6e
topology: v6e:2x2x1
jax: 0.10.0
libtpu: 0.0.40
codegen_flags: <defaults>
</compile_context>

<pallas_src>
import jax
import jax.numpy as jnp
import numpy as np
from jax.experimental import pallas as pl
from jax.experimental.pallas import tpu as pltpu


def _make_lstn_kernel(T, Bp, D, H, O):
    """Build the kernel with static shape parameters closed over."""

    def kernel(x_ref, w_ih_ref, w_hh_ref, b_ref, fc_w_ref, fc_b_ref,
               out_ref, xw_ref):
        # x_ref: (T*Bp, D) time-major, batch padded to Bp (multiple of 8)
        # w_ih_ref: (D, 4H), w_hh_ref: (H, 4H) -- PyTorch gate order [i,f,g,o]
        # b_ref: (1, 4H) = b_ih + b_hh
        # fc_w_ref: (H, O), fc_b_ref: (1, O)
        # out_ref: (Bp, O)
        # xw_ref:  (T*Bp, 4H) VMEM scratch holding the batched input projection

        # ---- batched input projection for all T steps (one MXU pass) -------
        xw_ref[...] = (
            jnp.dot(x_ref[...], w_ih_ref[...],
                    preferred_element_type=jnp.float32)
            + b_ref[...]                      # bias folded once, pre-loop
        )

        # ---- loop-invariant values hoisted out of the recurrence -----------
        lane = jax.lax.broadcasted_iota(jnp.int32, (Bp, 4 * H), 1)
        is_g = (lane >= 2 * H) & (lane < 3 * H)   # tanh lanes (gate g)
        w_hh = w_hh_ref[...]                      # keep recurrent weight in vregs

        # ---- time recurrence: (h, c) carried as loop values -----------------
        def step(t, carry):
            h, c = carry
            row = pl.multiple_of(t * Bp, Bp)          # sublane-aligned start
            gates = xw_ref[pl.ds(row, Bp), :] + jnp.dot(
                h, w_hh, preferred_element_type=jnp.float32)     # (Bp, 4H)

            # full-vreg nonlinearity: sigmoid on i/f/o lanes, tanh on g lanes
            act = jnp.where(is_g, jnp.tanh(gates), jax.nn.sigmoid(gates))

            i_g = act[:, 0 * H:1 * H]
            f_g = act[:, 1 * H:2 * H]
            g_g = act[:, 2 * H:3 * H]
            o_g = act[:, 3 * H:4 * H]

            c_new = f_g * c + i_g * g_g
            h_new = o_g * jnp.tanh(c_new)
            return h_new, c_new

        h0 = jnp.zeros((Bp, H), jnp.float32)
        c0 = jnp.zeros((Bp, H), jnp.float32)
        h_last, _ = jax.lax.fori_loop(0, T, step, (h0, c0), unroll=True)

        # ---- final Linear on the last hidden state --------------------------
        out_ref[...] = (
            jnp.dot(h_last, fc_w_ref[...], preferred_element_type=jnp.float32)
            + fc_b_ref[...]
        )

    return kernel


def lstn_forward(x, w_ih, w_hh, b_ih, b_hh, fc_w, fc_b):
    """x: (B, T, D) batch-first. PyTorch-shaped params:
       w_ih (4H, D), w_hh (4H, H), b_ih/b_hh (4H,), fc_w (O, H), fc_b (O,)."""
    B, T, D = x.shape
    H = w_hh.shape[1]
    O = fc_w.shape[0]

    # Pad batch to a full sublane group (multiple of 8).
    Bp = max(8, ((B + 7) // 8) * 8)

    x_tm = jnp.transpose(x, (1, 0, 2)).astype(jnp.float32)       # (T, B, D)
    if Bp != B:
        x_tm = jnp.pad(x_tm, ((0, 0), (0, Bp - B), (0, 0)))
    x_flat = x_tm.reshape(T * Bp, D)                             # (T*Bp, D)

    w_ih_t = jnp.transpose(w_ih).astype(jnp.float32)             # (D, 4H)
    w_hh_t = jnp.transpose(w_hh).astype(jnp.float32)             # (H, 4H)
    b = (b_ih + b_hh).reshape(1, 4 * H).astype(jnp.float32)      # (1, 4H)
    fc_w_t = jnp.transpose(fc_w).astype(jnp.float32)             # (H, O)
    fc_b2 = fc_b.reshape(1, O).astype(jnp.float32)               # (1, O)

    kernel = _make_lstn_kernel(T, Bp, D, H, O)

    out_padded = pl.pallas_call(
        kernel,
        out_shape=jax.ShapeDtypeStruct((Bp, O), jnp.float32),
        in_specs=[pl.BlockSpec(memory_space=pltpu.MemorySpace.VMEM)] * 6,
        out_specs=pl.BlockSpec(memory_space=pltpu.MemorySpace.VMEM),
        scratch_shapes=[pltpu.VMEM((T * Bp, 4 * H), jnp.float32)],
    )(x_flat, w_ih_t, w_hh_t, b, fc_w_t, fc_b2)

    return out_padded[:B]


def lstn_reference(x, w_ih, w_hh, b_ih, b_hh, fc_w, fc_b):
    """Pure-JAX reference mirroring torch.nn.LSTM + Linear forward."""
    B, T, D = x.shape
    H = w_hh.shape[1]
    h = jnp.zeros((B, H), jnp.float32)
    c = jnp.zeros((B, H), jnp.float32)
    for t in range(T):
        gates = x[:, t, :] @ w_ih.T + h @ w_hh.T + b_ih + b_hh
        i_g = jax.nn.sigmoid(gates[:, 0 * H:1 * H])
        f_g = jax.nn.sigmoid(gates[:, 1 * H:2 * H])
        g_g = jnp.tanh(gates[:, 2 * H:3 * H])
        o_g = jax.nn.sigmoid(gates[:, 3 * H:4 * H])
        c = f_g * c + i_g * g_g
        h = o_g * jnp.tanh(c)
    return h @ fc_w.T + fc_b


if __name__ == "__main__":
    # Small shapes consistent with the module's forward.
    B, T, D, H, O = 2, 8, 16, 32, 8

    key = jax.random.PRNGKey(0)
    ks = jax.random.split(key, 7)
    bound = 1.0 / np.sqrt(H)   # PyTorch default uniform(-1/sqrt(H), 1/sqrt(H))

    x = jax.random.normal(ks[0], (B, T, D), jnp.float32)
    w_ih = jax.random.uniform(ks[1], (4 * H, D), jnp.float32, -bound, bound)
    w_hh = jax.random.uniform(ks[2], (4 * H, H), jnp.float32, -bound, bound)
    b_ih = jax.random.uniform(ks[3], (4 * H,), jnp.float32, -bound, bound)
    b_hh = jax.random.uniform(ks[4], (4 * H,), jnp.float32, -bound, bound)
    fc_w = jax.random.uniform(ks[5], (O, H), jnp.float32, -bound, bound)
    fc_b = jax.random.uniform(ks[6], (O,), jnp.float32, -bound, bound)

    out = lstn_forward(x, w_ih, w_hh, b_ih, b_hh, fc_w, fc_b)
    out = jax.block_until_ready(out)

    ref = lstn_reference(x, w_ih, w_hh, b_ih, b_hh, fc_w, fc_b)
    np.testing.assert_allclose(np.asarray(out), np.asarray(ref),
                               rtol=1e-5, atol=1e-5)

    print("KERNEL_OK")
</pallas_src>

<mosaic_0001>
module attributes {stable_mosaic.version = 11 : i64} {
  func.func @kernel(%arg0: memref<64x16xf32, #tpu.memory_space<vmem>>, %arg1: memref<16x128xf32, #tpu.memory_space<vmem>>, %arg2: memref<32x128xf32, #tpu.memory_space<vmem>>, %arg3: memref<1x128xf32, #tpu.memory_space<vmem>>, %arg4: memref<32x8xf32, #tpu.memory_space<vmem>>, %arg5: memref<1x8xf32, #tpu.memory_space<vmem>>, %arg6: memref<8x8xf32, #tpu.memory_space<vmem>>, %arg7: memref<64x128xf32, #tpu.memory_space<vmem>>) attributes {dimension_semantics = [], scalar_prefetch = 0 : i64, scratch_operands = 1 : i64, tpu.core_type = #tpu.core_type<tc>} {
    %c0 = arith.constant 0 : index
    %c0_0 = arith.constant 0 : index
    %0 = vector.load %arg0[%c0, %c0_0] : memref<64x16xf32, #tpu.memory_space<vmem>>, vector<64x16xf32>
    %c0_1 = arith.constant 0 : index
    %c0_2 = arith.constant 0 : index
    %1 = vector.load %arg1[%c0_1, %c0_2] : memref<16x128xf32, #tpu.memory_space<vmem>>, vector<16x128xf32>
    %cst = arith.constant dense<0.000000e+00> : vector<64x128xf32>
    %2 = tpu.matmul %0, %1, %cst {dimension_numbers = #tpu.dot_dimension_numbers<[1], [0], [0], [1], [0, 0, 1, 1], [], []>} : vector<64x16xf32>, vector<16x128xf32>, vector<64x128xf32> -> vector<64x128xf32>
    %c0_3 = arith.constant 0 : index
    %c0_4 = arith.constant 0 : index
    %3 = vector.load %arg3[%c0_3, %c0_4] : memref<1x128xf32, #tpu.memory_space<vmem>>, vector<1x128xf32>
    %4 = vector.broadcast %3 : vector<1x128xf32> to vector<64x128xf32>
    %5 = arith.addf %2, %4 : vector<64x128xf32>
    %c0_5 = arith.constant 0 : index
    %c0_6 = arith.constant 0 : index
    %6 = vector.load %arg7[%c0_5, %c0_6] : memref<64x128xf32, #tpu.memory_space<vmem>>, vector<64x128xf32>
    tpu.vector_store %arg7[%c0_5, %c0_6], %5 {strides = array<i32>} : memref<64x128xf32, #tpu.memory_space<vmem>>, vector<64x128xf32>,
    %7 = tpu.iota {dimensions = array<i32: 1>} : vector<8x128xi32>
    %c64_i32 = arith.constant 64 : i32
    %8 = vector.broadcast %c64_i32 : i32 to vector<8x128xi32>
    %9 = arith.cmpi sge, %7, %8 : vector<8x128xi32>
    %c96_i32 = arith.constant 96 : i32
    %10 = vector.broadcast %c96_i32 : i32 to vector<8x128xi32>
    %11 = arith.cmpi slt, %7, %10 : vector<8x128xi32>
    %12 = arith.andi %9, %11 : vector<8x128xi1>
    %c0_7 = arith.constant 0 : index
    %c0_8 = arith.constant 0 : index
    %13 = vector.load %arg2[%c0_7, %c0_8] : memref<32x128xf32, #tpu.memory_space<vmem>>, vector<32x128xf32>
    %cst_9 = arith.constant 0.000000e+00 : f32
    %14 = vector.broadcast %cst_9 : f32 to vector<8x32xf32>
    %cst_10 = arith.constant 0.000000e+00 : f32
    %15 = vector.broadcast %cst_10 : f32 to vector<8x32xf32>
    %c0_i32 = arith.constant 0 : i32
    %c8_i32 = arith.constant 8 : i32
    %16 = arith.muli %c0_i32, %c8_i32 : i32
    %17 = tpu.assume_multiple %16, 8 : i32
    %18 = arith.index_cast %17 : i32 to index
    %c0_11 = arith.constant 0 : index
    %19 = vector.load %arg7[%18, %c0_11] : memref<64x128xf32, #tpu.memory_space<vmem>>, vector<8x128xf32>
    %cst_12 = arith.constant dense<0.000000e+00> : vector<8x128xf32>
    %20 = tpu.matmul %14, %13, %cst_12 {dimension_numbers = #tpu.dot_dimension_numbers<[1], [0], [0], [1], [0, 0, 1, 1], [], []>} : vector<8x32xf32>, vector<32x128xf32>, vector<8x128xf32> -> vector<8x128xf32>
    %21 = arith.addf %19, %20 : vector<8x128xf32>
    %22 = math.tanh %21 : vector<8x128xf32>
    %23 = arith.negf %21 : vector<8x128xf32>
    %24 = math.exp %23 : vector<8x128xf32>
    %cst_13 = arith.constant 1.000000e+00 : f32
    %25 = vector.broadcast %cst_13 : f32 to vector<8x128xf32>
    %26 = arith.addf %25, %24 : vector<8x128xf32>
    %27 = arith.divf %25, %26 : vector<8x128xf32>
    %28 = arith.select %12, %22, %27 : vector<8x128xi1>, vector<8x128xf32>
    %29 = vector.extract_strided_slice %28 {offsets = [0, 0], sizes = [8, 32], strides = [1, 1]} : vector<8x128xf32> to vector<8x32xf32>
    %30 = vector.extract_strided_slice %28 {offsets = [0, 32], sizes = [8, 32], strides = [1, 1]} : vector<8x128xf32> to vector<8x32xf32>
    %31 = vector.extract_strided_slice %28 {offsets = [0, 64], sizes = [8, 32], strides = [1, 1]} : vector<8x128xf32> to vector<8x32xf32>
    %32 = vector.extract_strided_slice %28 {offsets = [0, 96], sizes = [8, 32], strides = [1, 1]} : vector<8x128xf32> to vector<8x32xf32>
    %33 = arith.mulf %30, %15 : vector<8x32xf32>
    %34 = arith.mulf %29, %31 : vector<8x32xf32>
    %35 = arith.addf %33, %34 : vector<8x32xf32>
    %36 = math.tanh %35 : vector<8x32xf32>
    %37 = arith.mulf %32, %36 : vector<8x32xf32>
    %c1_i32 = arith.constant 1 : i32
    %c8_i32_14 = arith.constant 8 : i32
    %38 = arith.muli %c1_i32, %c8_i32_14 : i32
    %39 = tpu.assume_multiple %38, 8 : i32
    %40 = arith.index_cast %39 : i32 to index
    %c0_15 = arith.constant 0 : index
    %41 = vector.load %arg7[%40, %c0_15] : memref<64x128xf32, #tpu.memory_space<vmem>>, vector<8x128xf32>
    %cst_16 = arith.constant dense<0.000000e+00> : vector<8x128xf32>
    %42 = tpu.matmul %37, %13, %cst_16 {dimension_numbers = #tpu.dot_dimension_numbers<[1], [0], [0], [1], [0, 0, 1, 1], [], []>} : vector<8x32xf32>, vector<32x128xf32>, vector<8x128xf32> -> vector<8x128xf32>
    %43 = arith.addf %41, %42 : vector<8x128xf32>
    %44 = math.tanh %43 : vector<8x128xf32>
    %45 = arith.negf %43 : vector<8x128xf32>
    %46 = math.exp %45 : vector<8x128xf32>
    %cst_17 = arith.constant 1.000000e+00 : f32
    %47 = vector.broadcast %cst_17 : f32 to vector<8x128xf32>
    %48 = arith.addf %47, %46 : vector<8x128xf32>
    %49 = arith.divf %47, %48 : vector<8x128xf32>
    %50 = arith.select %12, %44, %49 : vector<8x128xi1>, vector<8x128xf32>
    %51 = vector.extract_strided_slice %50 {offsets = [0, 0], sizes = [8, 32], strides = [1, 1]} : vector<8x128xf32> to vector<8x32xf32>
    %52 = vector.extract_strided_slice %50 {offsets = [0, 32], sizes = [8, 32], strides = [1, 1]} : vector<8x128xf32> to vector<8x32xf32>
    %53 = vector.extract_strided_slice %50 {offsets = [0, 64], sizes = [8, 32], strides = [1, 1]} : vector<8x128xf32> to vector<8x32xf32>
    %54 = vector.extract_strided_slice %50 {offsets = [0, 96], sizes = [8, 32], strides = [1, 1]} : vector<8x128xf32> to vector<8x32xf32>
    %55 = arith.mulf %52, %35 : vector<8x32xf32>
    %56 = arith.mulf %51, %53 : vector<8x32xf32>
    %57 = arith.addf %55, %56 : vector<8x32xf32>
    %58 = math.tanh %57 : vector<8x32xf32>
    %59 = arith.mulf %54, %58 : vector<8x32xf32>
    %c2_i32 = arith.constant 2 : i32
    %c8_i32_18 = arith.constant 8 : i32
    %60 = arith.muli %c2_i32, %c8_i32_18 : i32
    %61 = tpu.assume_multiple %60, 8 : i32
    %62 = arith.index_cast %61 : i32 to index
    %c0_19 = arith.constant 0 : index
    %63 = vector.load %arg7[%62, %c0_19] : memref<64x128xf32, #tpu.memory_space<vmem>>, vector<8x128xf32>
    %cst_20 = arith.constant dense<0.000000e+00> : vector<8x128xf32>
    %64 = tpu.matmul %59, %13, %cst_20 {dimension_numbers = #tpu.dot_dimension_numbers<[1], [0], [0], [1], [0, 0, 1, 1], [], []>} : vector<8x32xf32>, vector<32x128xf32>, vector<8x128xf32> -> vector<8x128xf32>
    %65 = arith.addf %63, %64 : vector<8x128xf32>
    %66 = math.tanh %65 : vector<8x128xf32>
    %67 = arith.negf %65 : vector<8x128xf32>
    %68 = math.exp %67 : vector<8x128xf32>
    %cst_21 = arith.constant 1.000000e+00 : f32
    %69 = vector.broadcast %cst_21 : f32 to vector<8x128xf32>
    %70 = arith.addf %69, %68 : vector<8x128xf32>
    %71 = arith.divf %69, %70 : vector<8x128xf32>
    %72 = arith.select %12, %66, %71 : vector<8x128xi1>, vector<8x128xf32>
    %73 = vector.extract_strided_slice %72 {offsets = [0, 0], sizes = [8, 32], strides = [1, 1]} : vector<8x128xf32> to vector<8x32xf32>
    %74 = vector.extract_strided_slice %72 {offsets = [0, 32], sizes = [8, 32], strides = [1, 1]} : vector<8x128xf32> to vector<8x32xf32>
    %75 = vector.extract_strided_slice %72 {offsets = [0, 64], sizes = [8, 32], strides = [1, 1]} : vector<8x128xf32> to vector<8x32xf32>
    %76 = vector.extract_strided_slice %72 {offsets = [0, 96], sizes = [8, 32], strides = [1, 1]} : vector<8x128xf32> to vector<8x32xf32>
    %77 = arith.mulf %74, %57 : vector<8x32xf32>
    %78 = arith.mulf %73, %75 : vector<8x32xf32>
    %79 = arith.addf %77, %78 : vector<8x32xf32>
    %80 = math.tanh %79 : vector<8x32xf32>
    %81 = arith.mulf %76, %80 : vector<8x32xf32>
    %c3_i32 = arith.constant 3 : i32
    %c8_i32_22 = arith.constant 8 : i32
    %82 = arith.muli %c3_i32, %c8_i32_22 : i32
    %83 = tpu.assume_multiple %82, 8 : i32
    %84 = arith.index_cast %83 : i32 to index
    %c0_23 = arith.constant 0 : index
    %85 = vector.load %arg7[%84, %c0_23] : memref<64x128xf32, #tpu.memory_space<vmem>>, vector<8x128xf32>
    %cst_24 = arith.constant dense<0.000000e+00> : vector<8x128xf32>
    %86 = tpu.matmul %81, %13, %cst_24 {dimension_numbers = #tpu.dot_dimension_numbers<[1], [0], [0], [1], [0, 0, 1, 1], [], []>} : vector<8x32xf32>, vector<32x128xf32>, vector<8x128xf32> -> vector<8x128xf32>
    %87 = arith.addf %85, %86 : vector<8x128xf32>
    %88 = math.tanh %87 : vector<8x128xf32>
    %89 = arith.negf %87 : vector<8x128xf32>
    %90 = math.exp %89 : vector<8x128xf32>
    %cst_25 = arith.constant 1.000000e+00 : f32
    %91 = vector.broadcast %cst_25 : f32 to vector<8x128xf32>
    %92 = arith.addf %91, %90 : vector<8x128xf32>
    %93 = arith.divf %91, %92 : vector<8x128xf32>
    %94 = arith.select %12, %88, %93 : vector<8x128xi1>, vector<8x128xf32>
    %95 = vector.extract_strided_slice %94 {offsets = [0, 0], sizes = [8, 32], strides = [1, 1]} : vector<8x128xf32> to vector<8x32xf32>
    %96 = vector.extract_strided_slice %94 {offsets = [0, 32], sizes = [8, 32], strides = [1, 1]} : vector<8x128xf32> to vector<8x32xf32>
    %97 = vector.extract_strided_slice %94 {offsets = [0, 64], sizes = [8, 32], strides = [1, 1]} : vector<8x128xf32> to vector<8x32xf32>
    %98 = vector.extract_strided_slice %94 {offsets = [0, 96], sizes = [8, 32], strides = [1, 1]} : vector<8x128xf32> to vector<8x32xf32>
    %99 = arith.mulf %96, %79 : vector<8x32xf32>
    %100 = arith.mulf %95, %97 : vector<8x32xf32>
    %101 = arith.addf %99, %100 : vector<8x32xf32>
    %102 = math.tanh %101 : vector<8x32xf32>
    %103 = arith.mulf %98, %102 : vector<8x32xf32>
    %c4_i32 = arith.constant 4 : i32
    %c8_i32_26 = arith.constant 8 : i32
    %104 = arith.muli %c4_i32, %c8_i32_26 : i32
    %105 = tpu.assume_multiple %104, 8 : i32
    %106 = arith.index_cast %105 : i32 to index
    %c0_27 = arith.constant 0 : index
    %107 = vector.load %arg7[%106, %c0_27] : memref<64x128xf32, #tpu.memory_space<vmem>>, vector<8x128xf32>
    %cst_28 = arith.constant dense<0.000000e+00> : vector<8x128xf32>
    %108 = tpu.matmul %103, %13, %cst_28 {dimension_numbers = #tpu.dot_dimension_numbers<[1], [0], [0], [1], [0, 0, 1, 1], [], []>} : vector<8x32xf32>, vector<32x128xf32>, vector<8x128xf32> -> vector<8x128xf32>
    %109 = arith.addf %107, %108 : vector<8x128xf32>
    %110 = math.tanh %109 : vector<8x128xf32>
    %111 = arith.negf %109 : vector<8x128xf32>
    %112 = math.exp %111 : vector<8x128xf32>
    %cst_29 = arith.constant 1.000000e+00 : f32
    %113 = vector.broadcast %cst_29 : f32 to vector<8x128xf32>
    %114 = arith.addf %113, %112 : vector<8x128xf32>
    %115 = arith.divf %113, %114 : vector<8x128xf32>
    %116 = arith.select %12, %110, %115 : vector<8x128xi1>, vector<8x128xf32>
    %117 = vector.extract_strided_slice %116 {offsets = [0, 0], sizes = [8, 32], strides = [1, 1]} : vector<8x128xf32> to vector<8x32xf32>
    %118 = vector.extract_strided_slice %116 {offsets = [0, 32], sizes = [8, 32], strides = [1, 1]} : vector<8x128xf32> to vector<8x32xf32>
    %119 = vector.extract_strided_slice %116 {offsets = [0, 64], sizes = [8, 32], strides = [1, 1]} : vector<8x128xf32> to vector<8x32xf32>
    %120 = vector.extract_strided_slice %116 {offsets = [0, 96], sizes = [8, 32], strides = [1, 1]} : vector<8x128xf32> to vector<8x32xf32>
    %121 = arith.mulf %118, %101 : vector<8x32xf32>
    %122 = arith.mulf %117, %119 : vector<8x32xf32>
    %123 = arith.addf %121, %122 : vector<8x32xf32>
    %124 = math.tanh %123 : vector<8x32xf32>
    %125 = arith.mulf %120, %124 : vector<8x32xf32>
    %c5_i32 = arith.constant 5 : i32
    %c8_i32_30 = arith.constant 8 : i32
    %126 = arith.muli %c5_i32, %c8_i32_30 : i32
    %127 = tpu.assume_multiple %126, 8 : i32
    %128 = arith.index_cast %127 : i32 to index
    %c0_31 = arith.constant 0 : index
    %129 = vector.load %arg7[%128, %c0_31] : memref<64x128xf32, #tpu.memory_space<vmem>>, vector<8x128xf32>
    %cst_32 = arith.constant dense<0.000000e+00> : vector<8x128xf32>
    %130 = tpu.matmul %125, %13, %cst_32 {dimension_numbers = #tpu.dot_dimension_numbers<[1], [0], [0], [1], [0, 0, 1, 1], [], []>} : vector<8x32xf32>, vector<32x128xf32>, vector<8x128xf32> -> vector<8x128xf32>
    %131 = arith.addf %129, %130 : vector<8x128xf32>
    %132 = math.tanh %131 : vector<8x128xf32>
    %133 = arith.negf %131 : vector<8x128xf32>
    %134 = math.exp %133 : vector<8x128xf32>
    %cst_33 = arith.constant 1.000000e+00 : f32
    %135 = vector.broadcast %cst_33 : f32 to vector<8x128xf32>
    %136 = arith.addf %135, %134 : vector<8x128xf32>
    %137 = arith.divf %135, %136 : vector<8x128xf32>
    %138 = arith.select %12, %132, %137 : vector<8x128xi1>, vector<8x128xf32>
    %139 = vector.extract_strided_slice %138 {offsets = [0, 0], sizes = [8, 32], strides = [1, 1]} : vector<8x128xf32> to vector<8x32xf32>
    %140 = vector.extract_strided_slice %138 {offsets = [0, 32], sizes = [8, 32], strides = [1, 1]} : vector<8x128xf32> to vector<8x32xf32>
    %141 = vector.extract_strided_slice %138 {offsets = [0, 64], sizes = [8, 32], strides = [1, 1]} : vector<8x128xf32> to vector<8x32xf32>
    %142 = vector.extract_strided_slice %138 {offsets = [0, 96], sizes = [8, 32], strides = [1, 1]} : vector<8x128xf32> to vector<8x32xf32>
    %143 = arith.mulf %140, %123 : vector<8x32xf32>
    %144 = arith.mulf %139, %141 : vector<8x32xf32>
    %145 = arith.addf %143, %144 : vector<8x32xf32>
    %146 = math.tanh %145 : vector<8x32xf32>
    %147 = arith.mulf %142, %146 : vector<8x32xf32>
    %c6_i32 = arith.constant 6 : i32
    %c8_i32_34 = arith.constant 8 : i32
    %148 = arith.muli %c6_i32, %c8_i32_34 : i32
    %149 = tpu.assume_multiple %148, 8 : i32
    %150 = arith.index_cast %149 : i32 to index
    %c0_35 = arith.constant 0 : index
    %151 = vector.load %arg7[%150, %c0_35] : memref<64x128xf32, #tpu.memory_space<vmem>>, vector<8x128xf32>
    %cst_36 = arith.constant dense<0.000000e+00> : vector<8x128xf32>
    %152 = tpu.matmul %147, %13, %cst_36 {dimension_numbers = #tpu.dot_dimension_numbers<[1], [0], [0], [1], [0, 0, 1, 1], [], []>} : vector<8x32xf32>, vector<32x128xf32>, vector<8x128xf32> -> vector<8x128xf32>
    %153 = arith.addf %151, %152 : vector<8x128xf32>
    %154 = math.tanh %153 : vector<8x128xf32>
    %155 = arith.negf %153 : vector<8x128xf32>
    %156 = math.exp %155 : vector<8x128xf32>
    %cst_37 = arith.constant 1.000000e+00 : f32
    %157 = vector.broadcast %cst_37 : f32 to vector<8x128xf32>
    %158 = arith.addf %157, %156 : vector<8x128xf32>
    %159 = arith.divf %157, %158 : vector<8x128xf32>
    %160 = arith.select %12, %154, %159 : vector<8x128xi1>, vector<8x128xf32>
    %161 = vector.extract_strided_slice %160 {offsets = [0, 0], sizes = [8, 32], strides = [1, 1]} : vector<8x128xf32> to vector<8x32xf32>
    %162 = vector.extract_strided_slice %160 {offsets = [0, 32], sizes = [8, 32], strides = [1, 1]} : vector<8x128xf32> to vector<8x32xf32>
    %163 = vector.extract_strided_slice %160 {offsets = [0, 64], sizes = [8, 32], strides = [1, 1]} : vector<8x128xf32> to vector<8x32xf32>
    %164 = vector.extract_strided_slice %160 {offsets = [0, 96], sizes = [8, 32], strides = [1, 1]} : vector<8x128xf32> to vector<8x32xf32>
    %165 = arith.mulf %162, %145 : vector<8x32xf32>
    %166 = arith.mulf %161, %163 : vector<8x32xf32>
    %167 = arith.addf %165, %166 : vector<8x32xf32>
    %168 = math.tanh %167 : vector<8x32xf32>
    %169 = arith.mulf %164, %168 : vector<8x32xf32>
    %c7_i32 = arith.constant 7 : i32
    %c8_i32_38 = arith.constant 8 : i32
    %170 = arith.muli %c7_i32, %c8_i32_38 : i32
    %171 = tpu.assume_multiple %170, 8 : i32
    %172 = arith.index_cast %171 : i32 to index
    %c0_39 = arith.constant 0 : index
    %173 = vector.load %arg7[%172, %c0_39] : memref<64x128xf32, #tpu.memory_space<vmem>>, vector<8x128xf32>
    %cst_40 = arith.constant dense<0.000000e+00> : vector<8x128xf32>
    %174 = tpu.matmul %169, %13, %cst_40 {dimension_numbers = #tpu.dot_dimension_numbers<[1], [0], [0], [1], [0, 0, 1, 1], [], []>} : vector<8x32xf32>, vector<32x128xf32>, vector<8x128xf32> -> vector<8x128xf32>
    %175 = arith.addf %173, %174 : vector<8x128xf32>
    %176 = math.tanh %175 : vector<8x128xf32>
    %177 = arith.negf %175 : vector<8x128xf32>
    %178 = math.exp %177 : vector<8x128xf32>
    %cst_41 = arith.constant 1.000000e+00 : f32
    %179 = vector.broadcast %cst_41 : f32 to vector<8x128xf32>
    %180 = arith.addf %179, %178 : vector<8x128xf32>
    %181 = arith.divf %179, %180 : vector<8x128xf32>
    %182 = arith.select %12, %176, %181 : vector<8x128xi1>, vector<8x128xf32>
    %183 = vector.extract_strided_slice %182 {offsets = [0, 0], sizes = [8, 32], strides = [1, 1]} : vector<8x128xf32> to vector<8x32xf32>
    %184 = vector.extract_strided_slice %182 {offsets = [0, 32], sizes = [8, 32], strides = [1, 1]} : vector<8x128xf32> to vector<8x32xf32>
    %185 = vector.extract_strided_slice %182 {offsets = [0, 64], sizes = [8, 32], strides = [1, 1]} : vector<8x128xf32> to vector<8x32xf32>
    %186 = vector.extract_strided_slice %182 {offsets = [0, 96], sizes = [8, 32], strides = [1, 1]} : vector<8x128xf32> to vector<8x32xf32>
    %187 = arith.mulf %184, %167 : vector<8x32xf32>
    %188 = arith.mulf %183, %185 : vector<8x32xf32>
    %189 = arith.addf %187, %188 : vector<8x32xf32>
    %190 = math.tanh %189 : vector<8x32xf32>
    %191 = arith.mulf %186, %190 : vector<8x32xf32>
    %c8_i32_42 = arith.constant 8 : i32
    %c0_43 = arith.constant 0 : index
    %c0_44 = arith.constant 0 : index
    %192 = vector.load %arg4[%c0_43, %c0_44] : memref<32x8xf32, #tpu.memory_space<vmem>>, vector<32x8xf32>
    %cst_45 = arith.constant dense<0.000000e+00> : vector<8x8xf32>
    %193 = tpu.matmul %191, %192, %cst_45 {dimension_numbers = #tpu.dot_dimension_numbers<[1], [0], [0], [1], [0, 0, 1, 1], [], []>} : vector<8x32xf32>, vector<32x8xf32>, vector<8x8xf32> -> vector<8x8xf32>
    %c0_46 = arith.constant 0 : index
    %c0_47 = arith.constant 0 : index
    %194 = vector.load %arg5[%c0_46, %c0_47] : memref<1x8xf32, #tpu.memory_space<vmem>>, vector<1x8xf32>
    %195 = vector.broadcast %194 : vector<1x8xf32> to vector<8x8xf32>
    %196 = arith.addf %193, %195 : vector<8x8xf32>
    %c0_48 = arith.constant 0 : index
    %c0_49 = arith.constant 0 : index
    %197 = vector.load %arg6[%c0_48, %c0_49] : memref<8x8xf32, #tpu.memory_space<vmem>>, vector<8x8xf32>
    tpu.vector_store %arg6[%c0_48, %c0_49], %196 {strides = array<i32>} : memref<8x8xf32, #tpu.memory_space<vmem>>, vector<8x8xf32>,
    return
  }
}

</mosaic_0001>

<bundles_post_ra>
// kernel: tpu_custom_call.1
= control target key start
LH: loop header
LB: loop body
LE: loop exit
PB: predicated region body
PF: predicated region fallthrough
CT: control target
= control target key end

     0   :  { %v1399_v3 = vmov 0.0   ;;  %vm41_vm0 = vcmask 130048   ;;  %s1687_s0 = inlined_call_operand.vmem [shape: f32[64,16], index: 0, kind: input, shape index: {}]   ;;  %s1688_s1 = inlined_call_operand.vmem [shape: f32[16,128], index: 1, kind: input, shape index: {}]   ;;  %s1689_s2 = inlined_call_operand.vmem [shape: f32[32,128], index: 2, kind: input, shape index: {}]   ;;  %s1690_s3 = inlined_call_operand.vmem [shape: f32[1,128], index: 3, kind: input, shape index: {}]   ;;  %s1691_s4 = inlined_call_operand.vmem [shape: f32[32,8], index: 4, kind: input, shape index: {}]   ;;  %s1692_s5 = inlined_call_operand.vmem [shape: f32[1,8], index: 5, kind: input, shape index: {}]   ;;  %s1693_s6 = inlined_call_operand.hbm [shape: f32[8,8], index: 6, kind: output, shape index: {}]  }
   0x1   :  { %v33_v0 = vld [vmem:[%s1688_s1 + $0x8] sm:$0xff]  ;;  %v1445_v1 = vld [vmem:[%s1689_s2 + $0x18] sm:$0xff]  ;;  %v32_v2 = vld [vmem:[%s1688_s1] sm:$0xff]  ;;  %1209 = vmatprep.subr.mxu1 %v1399_v3 }
   0x2   :  { %1193 = vmatprep.subr.mxu0 %v33_v0  ;;  %v24_v4 = vld [vmem:[%s1687_s0] sm:$0xff]  ;;  %1210 = vmatpush3.msra.mxu1 %v1445_v1  ;;  %v1458_v5 = vld [vmem:[%s1689_s2 + $0x10] sm:$0xff]  ;;  %v25_v6 = vld [vmem:[%s1687_s0 + $0x8] sm:$0xff] }
   0x3   :  { %1194 = vmatpush3.msra.mxu0 %v33_v0 }
   0x4   :  { %11 = vsyncpa [#allocation4], 0  ;;  %1195 = vmatprep.subr.mxu0 %v32_v2  ;;  %1211 = vmatprep.subr.mxu1 %v1399_v3  ;;  %v1468_v7 = vld [vmem:[%s1689_s2 + $0x8] sm:$0xff]  ;;  %v1476_v8 = vld [vmem:[%s1689_s2] sm:$0xff]  ;;  %vm1400_vm1 = vmmov 0   ;;  %v179_v19 = vlaneseq  ;;  %s1402_s13 = smov 32  }
   0x5   :  { %1196 = vmatpush3.msra.mxu0 %v32_v2  ;;  %1197 = vmatprep.mubr.msk.f32.mxu0 %vm41_vm0, %v24_v4  ;;  %v1507_v10 = vld [vmem:[%s1690_s3] ss:$0 sm:$0xff]  ;;  %s1401_s3 = smov 64   ;;  %vm189_vm5 = vcmask 261120   ;;  %v26_v49 = vld [vmem:[%s1687_s0 + $0x10] sm:$0xff]  ;;  %v27_v50 = vld [vmem:[%s1687_s0 + $0x18] sm:$0xff] }
   0x6   :  { %1212 = vmatpush3.msra.mxu1 %v1458_v5  ;;  %1198 = vmatmul.mubr.msk.f32.vlgmr.msra.gmra.mxu0 %vm41_vm0, %v25_v6  ;;  %v180_v20 = vand.u32 127, %v179_v19  ;;  %v28_v51 = vld [vmem:[%s1687_s0 + $0x20] sm:$0xff]  ;;  %v29_v52 = vld [vmem:[%s1687_s0 + $0x28] sm:$0xff]  ;;  %v30_v53 = vld [vmem:[%s1687_s0 + $0x30] sm:$0xff]  ;;  %s1403_s10 = smov [#allocation3]   ;;  %vm1096_vm6 = vcmask 64512  }
   0x7   :  { %1213 = vmatprep.subr.mxu1 %v1399_v3  ;;  %1217 = vmatprep.mubr.msk.f32.mxu1 %vm1400_vm1, %v1399_v3  ;;  %v31_v54 = vld [vmem:[%s1687_s0 + $0x38] sm:$0xff]  ;;  %v1011_v21 = vld [vmem:[%s1691_s4 + $0x8] sm:$0xff] }
   0x8   :  { %1214 = vmatpush3.msra.mxu1 %v1468_v7  ;;  %1231 = vmatprep.subr.mxu0 %v1399_v3  ;;  %vm181_vm2 = vcmp.ge.s32.totalorder %v180_v20, 64  ;;  %vm182_vm3 = vcmp.lt.s32.totalorder %v180_v20, 96 }
   0x9   :  { %1215 = vmatprep.subr.mxu1 %v1399_v3  ;;  %1232 = vmatpush3.msra.mxu0 %v1445_v1  ;;  %vm1510_vm4 = vmand %vm181_vm2, %vm182_vm3 }
   0xa   :  { %1216 = vmatpush3.msra.mxu1 %v1476_v8  ;;  %1233 = vmatprep.subr.mxu0 %v1399_v3 }
   0xb   :  { %1218 = vmatmul.mubr.f32.vlgmr.msra.gmra.mxu1 %v1399_v3  ;;  %1220 = vmatprep.subr.mxu1 %v1399_v3 }
   0xc   :  { %1221 = vmatpush3.msra.mxu1 %v1445_v1  ;;  %1228 = vmatprep.mubr.msk.f32.mxu1 %vm1400_vm1, %v1399_v3 }
   0xd   :  { %1222 = vmatprep.subr.mxu1 %v1399_v3  ;;  %1234 = vmatpush3.msra.mxu0 %v1458_v5 }
   0xe   :  { %1223 = vmatpush3.msra.mxu1 %v1458_v5  ;;  %1235 = vmatprep.subr.mxu0 %v1399_v3 }
   0xf   :  { %1224 = vmatprep.subr.mxu1 %v1399_v3  ;;  %1236 = vmatpush3.msra.mxu0 %v1468_v7 }
  0x10   :  { %1225 = vmatpush3.msra.mxu1 %v1468_v7  ;;  %1237 = vmatprep.subr.mxu0 %v1399_v3 }
  0x11   :  { %1226 = vmatprep.subr.mxu1 %v1399_v3  ;;  %1238 = vmatpush3.msra.mxu0 %v1476_v8 }
  0x12   :  { %1227 = vmatpush3.msra.mxu1 %v1476_v8  ;;  %1253 = vmatprep.subr.mxu0 %v1399_v3 }
  0x13   :  { %1242 = vmatprep.subr.mxu1 %v1399_v3  ;;  %1200 = vmatprep.mubr.msk.f32.mxu0 %vm41_vm0, %v26_v49 }
  0x14   :  { %1201 = vmatmul.mubr.msk.f32.gmra.mxu0 %vm41_vm0, %v27_v50 }
  0x15   :  { %1203 = vmatprep.mubr.msk.f32.mxu0 %vm41_vm0, %v28_v51 }
  0x18   :  { %1204 = vmatmul.mubr.msk.f32.gmra.mxu0 %vm41_vm0, %v29_v52 }
  0x19   :  { %1206 = vmatprep.mubr.msk.f32.mxu0 %vm41_vm0, %v30_v53 }
  0x1c   :  { %1207 = vmatmul.mubr.msk.f32.gmra.mxu0 %vm41_vm0, %v31_v54 }
  0x1d   :  { %1239 = vmatprep.mubr.msk.f32.mxu0 %vm1400_vm1, %v1399_v3 }
  0xc6   :  { %v1199_v9 = vpop.f32.mrf.mxu0 }
  0xc7   :  { %v138_v34 = vadd.f32 %v1199_v9, %v1507_v10 }
  0xc8   :  { %v132_v11 = vpop.f32.mrf.mxu0 }
  0xc9   :  { %v133_v12 = vadd.f32 %v1507_v10, %v132_v11 }
  0xcb   :  { %v259_v13 = vpop.f32.mrf.mxu1 }
  0xcc   :  { %v263_v14 = vadd.f32 %v259_v13, %v133_v12 }
  0xcd   :  { %v1219_v15 = vpop.f32.mrf.mxu1 }
  0xce   :  { %v1121_v16 = vmul.f32 -1.442695, %v263_v14 }
  0xd0   :  { %1313 = vpow2.f32 %v1121_v16 }
  0xd1   :  { %1315 = vtanh.f32 %v263_v14 }
  0xd4   :  { %v1202_v59 = vpop.f32.mrf.mxu0 }
  0xd6   :  { %v142_v60 = vpop.f32.mrf.mxu0 }
  0xd7   :  { %v143_v2 = vadd.f32 %v1507_v10, %v142_v60 }
  0xd8   :  { %v1575_v61 = vpop.f32.mrf.mxu0 }
  0xda   :  { %v1577_v62 = vpop.f32.mrf.mxu0 }
  0xdc   :  { %v1579_v63 = vpop.f32.mrf.mxu0 }
  0xdd   :  { %v1314_v17 = vpop.eup %1313 }
  0xde   :  { %v268_v18 = vadd.f32 1.0, %v1314_v17  ;;  %v1316_v22 = vpop.eup %1315  ;;  %v1581_v0 = vpop.f32.mrf.mxu0 }
  0xe0   :  { %1317 = vrcp.f32 %v268_v18 }
  0xed   :  { %v1318_v23 = vpop.eup %1317 }
  0xee   :  { %v271_v24 = vsel %vm1510_vm4, %v1316_v22, %v1318_v23 }
  0xef   :  { %274 = vrot.lane.b32.xlu0 %v271_v24, %s1401_s3  ;;  %v272_v27 = vmul.f32 0.0, %v271_v24 }
 0x161   :  { %v275_v25 = vpop.permute.xlu0 %274 }
 0x162   :  { %v277_v26 = vmul.f32 %v275_v25, %v271_v24 }
 0x164   :  { %279 = vrot.lane.b32.xlu0 %v277_v26, %s1402_s13 }
 0x1d6   :  { %v280_v28 = vpop.permute.xlu0 %279 }
 0x1d7   :  { %v282_v29 = vadd.f32 %v280_v28, %v272_v27  ;;  %v148_v27 = vadd.f32 %v1202_v59, %v1507_v10 }
 0x1d9   :  { %1319 = vtanh.f32 %v282_v29 }
 0x1e6   :  { %v1320_v30 = vpop.eup %1319 }
 0x1e7   :  { %285 = vrot.lane.b32.xlu1 %v1320_v30, %s1401_s3 }
 0x259   :  { %v286_v31 = vpop.permute.xlu1 %285 }
 0x25a   :  { %v288_v32 = vmul.f32 %v286_v31, %v271_v24 }
 0x25c   :  { %292 = vrot.lane.b32.xlu1 %v288_v32, %s1402_s13 }
 0x2ce   :  { %v293_v33 = vpop.permute.xlu1 %292 }
 0x2cf   :  { %1229 = vmatmul.mubr.msk.f32.vlgmr.msra.gmra.mxu1 %vm189_vm5, %v293_v33 }
 0x2d0   :  { %1243 = vmatpush3.msra.mxu1 %v1445_v1  ;;  %1250 = vmatprep.mubr.msk.f32.mxu1 %vm1400_vm1, %v1399_v3 }
 0x2d1   :  { %1244 = vmatprep.subr.mxu1 %v1399_v3 }
 0x2d2   :  { %1245 = vmatpush3.msra.mxu1 %v1458_v5 }
 0x2d3   :  { %1246 = vmatprep.subr.mxu1 %v1399_v3 }
 0x2d4   :  { %1247 = vmatpush3.msra.mxu1 %v1468_v7 }
 0x2d5   :  { %1248 = vmatprep.subr.mxu1 %v1399_v3 }
 0x2d6   :  { %1249 = vmatpush3.msra.mxu1 %v1476_v8 }
 0x2d7   :  { %1264 = vmatprep.subr.mxu1 %v1399_v3 }
 0x38f   :  { %v362_v35 = vpop.f32.mrf.mxu1 }
 0x390   :  { %v366_v36 = vadd.f32 %v362_v35, %v138_v34 }
 0x391   :  { %v1230_v37 = vpop.f32.mrf.mxu1 }
 0x392   :  { %v1123_v38 = vmul.f32 -1.442695, %v366_v36 }
 0x394   :  { %1321 = vpow2.f32 %v1123_v38 }
 0x395   :  { %1323 = vtanh.f32 %v366_v36 }
 0x3a1   :  { %v1322_v39 = vpop.eup %1321 }
 0x3a2   :  { %v371_v40 = vadd.f32 1.0, %v1322_v39  ;;  %v1324_v41 = vpop.eup %1323 }
 0x3a4   :  { %1325 = vrcp.f32 %v371_v40 }
 0x3b1   :  { %v1326_v42 = vpop.eup %1325 }
 0x3b2   :  { %v374_v43 = vsel %vm1510_vm4, %v1324_v41, %v1326_v42 }
 0x3b3   :  { %377 = vrot.lane.b32.xlu0 %v374_v43, %s1401_s3  ;;  %v375_v46 = vmul.f32 %v374_v43, %v282_v29 }
 0x425   :  { %v378_v44 = vpop.permute.xlu0 %377 }
 0x426   :  { %v380_v45 = vmul.f32 %v378_v44, %v374_v43 }
 0x428   :  { %382 = vrot.lane.b32.xlu1 %v380_v45, %s1402_s13 }
 0x49a   :  { %v383_v47 = vpop.permute.xlu1 %382 }
 0x49b   :  { %v385_v48 = vadd.f32 %v383_v47, %v375_v46  ;;  %v153_v46 = vadd.f32 %v1507_v10, %v1577_v62 }
 0x49d   :  { %1327 = vtanh.f32 %v385_v48 }
 0x4aa   :  { %v1328_v55 = vpop.eup %1327 }
 0x4ab   :  { %388 = vrot.lane.b32.xlu0 %v1328_v55, %s1401_s3 }
 0x51d   :  { %v389_v56 = vpop.permute.xlu0 %388 }
 0x51e   :  { %v391_v57 = vmul.f32 %v389_v56, %v374_v43 }
 0x520   :  { %395 = vrot.lane.b32.xlu1 %v391_v57, %s1402_s13 }
 0x592   :  { %v396_v58 = vpop.permute.xlu1 %395 }
 0x593   :  { %1240 = vmatmul.mubr.msk.f32.vlgmr.msra.gmra.mxu0 %vm189_vm5, %v396_v58 }
 0x594   :  { %1254 = vmatpush3.msra.mxu0 %v1445_v1  ;;  %1261 = vmatprep.mubr.msk.f32.mxu0 %vm1400_vm1, %v1399_v3 }
 0x595   :  { %1255 = vmatprep.subr.mxu0 %v1399_v3 }
 0x596   :  { %1256 = vmatpush3.msra.mxu0 %v1458_v5 }
 0x597   :  { %1257 = vmatprep.subr.mxu0 %v1399_v3 }
 0x598   :  { %1258 = vmatpush3.msra.mxu0 %v1468_v7 }
 0x599   :  { %1259 = vmatprep.subr.mxu0 %v1399_v3 }
 0x59a   :  { %1260 = vmatpush3.msra.mxu0 %v1476_v8 }
 0x59b   :  { %1275 = vmatprep.subr.mxu0 %v1399_v3 }
 0x653   :  { %v465_v4 = vpop.f32.mrf.mxu0 }
 0x654   :  { %v469_v6 = vadd.f32 %v465_v4, %v143_v2 }
 0x655   :  { %v1241_v9 = vpop.f32.mrf.mxu0 }
 0x656   :  { %v1125_v11 = vmul.f32 -1.442695, %v469_v6  ;;  %v158_v9 = vadd.f32 %v1575_v61, %v1507_v10 }
 0x658   :  { %1329 = vpow2.f32 %v1125_v11 }
 0x659   :  { %1331 = vtanh.f32 %v469_v6 }
 0x665   :  { %v1330_v12 = vpop.eup %1329 }
 0x666   :  { %v474_v13 = vadd.f32 1.0, %v1330_v12  ;;  %v1332_v14 = vpop.eup %1331 }
 0x668   :  { %1333 = vrcp.f32 %v474_v13 }
 0x675   :  { %v1334_v15 = vpop.eup %1333 }
 0x676   :  { %v477_v16 = vsel %vm1510_vm4, %v1332_v14, %v1334_v15 }
 0x677   :  { %480 = vrot.lane.b32.xlu0 %v477_v16, %s1401_s3  ;;  %v478_v19 = vmul.f32 %v477_v16, %v385_v48 }
 0x6e9   :  { %v481_v17 = vpop.permute.xlu0 %480 }
 0x6ea   :  { %v483_v18 = vmul.f32 %v481_v17, %v477_v16 }
 0x6ec   :  { %485 = vrot.lane.b32.xlu1 %v483_v18, %s1402_s13 }
 0x75e   :  { %v486_v20 = vpop.permute.xlu1 %485 }
 0x75f   :  { %v488_v22 = vadd.f32 %v486_v20, %v478_v19 }
 0x761   :  { %1335 = vtanh.f32 %v488_v22 }
 0x76e   :  { %v1336_v23 = vpop.eup %1335 }
 0x76f   :  { %491 = vrot.lane.b32.xlu0 %v1336_v23, %s1401_s3 }
 0x7e1   :  { %v492_v24 = vpop.permute.xlu0 %491 }
 0x7e2   :  { %v494_v25 = vmul.f32 %v492_v24, %v477_v16 }
 0x7e4   :  { %498 = vrot.lane.b32.xlu1 %v494_v25, %s1402_s13  ;;  %v163_v25 = vadd.f32 %v1507_v10, %v1581_v0 }
 0x856   :  { %v499_v26 = vpop.permute.xlu1 %498 }
 0x857   :  { %1251 = vmatmul.mubr.msk.f32.vlgmr.msra.gmra.mxu1 %vm189_vm5, %v499_v26 }
 0x858   :  { %1265 = vmatpush3.msra.mxu1 %v1445_v1  ;;  %1272 = vmatprep.mubr.msk.f32.mxu1 %vm1400_vm1, %v1399_v3 }
 0x859   :  { %1266 = vmatprep.subr.mxu1 %v1399_v3 }
 0x85a   :  { %1267 = vmatpush3.msra.mxu1 %v1458_v5 }
 0x85b   :  { %1268 = vmatprep.subr.mxu1 %v1399_v3 }
 0x85c   :  { %1269 = vmatpush3.msra.mxu1 %v1468_v7 }
 0x85d   :  { %1270 = vmatprep.subr.mxu1 %v1399_v3 }
 0x85e   :  { %1271 = vmatpush3.msra.mxu1 %v1476_v8 }
 0x85f   :  { %1286 = vmatprep.subr.mxu1 %v1399_v3 }
 0x917   :  { %v568_v28 = vpop.f32.mrf.mxu1 }
 0x918   :  { %v572_v29 = vadd.f32 %v568_v28, %v148_v27 }
 0x919   :  { %v1252_v30 = vpop.f32.mrf.mxu1 }
 0x91a   :  { %v1127_v31 = vmul.f32 -1.442695, %v572_v29 }
 0x91c   :  { %1337 = vpow2.f32 %v1127_v31 }
 0x91d   :  { %1339 = vtanh.f32 %v572_v29 }
 0x929   :  { %v1338_v32 = vpop.eup %1337 }
 0x92a   :  { %v577_v33 = vadd.f32 1.0, %v1338_v32  ;;  %v1340_v34 = vpop.eup %1339 }
 0x92c   :  { %1341 = vrcp.f32 %v577_v33 }
 0x939   :  { %v1342_v35 = vpop.eup %1341 }
 0x93a   :  { %v580_v36 = vsel %vm1510_vm4, %v1340_v34, %v1342_v35 }
 0x93b   :  { %583 = vrot.lane.b32.xlu0 %v580_v36, %s1401_s3  ;;  %v581_v39 = vmul.f32 %v580_v36, %v488_v22 }
 0x9ad   :  { %v584_v37 = vpop.permute.xlu0 %583 }
 0x9ae   :  { %v586_v38 = vmul.f32 %v584_v37, %v580_v36 }
 0x9b0   :  { %588 = vrot.lane.b32.xlu1 %v586_v38, %s1402_s13 }
 0xa22   :  { %v589_v40 = vpop.permute.xlu1 %588 }
 0xa23   :  { %v591_v41 = vadd.f32 %v589_v40, %v581_v39 }
 0xa25   :  { %1343 = vtanh.f32 %v591_v41 }
 0xa32   :  { %v1344_v42 = vpop.eup %1343 }
 0xa33   :  { %594 = vrot.lane.b32.xlu0 %v1344_v42, %s1401_s3 }
 0xaa5   :  { %v595_v43 = vpop.permute.xlu0 %594 }
 0xaa6   :  { %v597_v44 = vmul.f32 %v595_v43, %v580_v36  ;;  %v168_v43 = vadd.f32 %v1579_v63, %v1507_v10 }
 0xaa8   :  { %601 = vrot.lane.b32.xlu1 %v597_v44, %s1402_s13 }
 0xb1a   :  { %v602_v45 = vpop.permute.xlu1 %601 }
 0xb1b   :  { %1262 = vmatmul.mubr.msk.f32.vlgmr.msra.gmra.mxu0 %vm189_vm5, %v602_v45 }
 0xb1c   :  { %1276 = vmatpush3.msra.mxu0 %v1445_v1  ;;  %1283 = vmatprep.mubr.msk.f32.mxu0 %vm1400_vm1, %v1399_v3 }
 0xb1d   :  { %1277 = vmatprep.subr.mxu0 %v1399_v3 }
 0xb1e   :  { %1278 = vmatpush3.msra.mxu0 %v1458_v5 }
 0xb1f   :  { %1279 = vmatprep.subr.mxu0 %v1399_v3 }
 0xb20   :  { %1280 = vmatpush3.msra.mxu0 %v1468_v7 }
 0xb21   :  { %1281 = vmatprep.subr.mxu0 %v1399_v3 }
 0xb22   :  { %1282 = vmatpush3.msra.mxu0 %v1476_v8 }
 0xb23   :  { %1297 = vmatprep.subr.mxu0 %v1399_v3 }
 0xbdb   :  { %v671_v47 = vpop.f32.mrf.mxu0 }
 0xbdc   :  { %v675_v48 = vadd.f32 %v671_v47, %v153_v46 }
 0xbdd   :  { %v1263_v49 = vpop.f32.mrf.mxu0 }
 0xbde   :  { %v1129_v50 = vmul.f32 -1.442695, %v675_v48 }
 0xbe0   :  { %1345 = vpow2.f32 %v1129_v50 }
 0xbe1   :  { %1347 = vtanh.f32 %v675_v48 }
 0xbed   :  { %v1346_v51 = vpop.eup %1345 }
 0xbee   :  { %v680_v52 = vadd.f32 1.0, %v1346_v51  ;;  %v1348_v53 = vpop.eup %1347 }
 0xbf0   :  { %1349 = vrcp.f32 %v680_v52 }
 0xbfd   :  { %v1350_v54 = vpop.eup %1349 }
 0xbfe   :  { %v683_v55 = vsel %vm1510_vm4, %v1348_v53, %v1350_v54 }
 0xbff   :  { %686 = vrot.lane.b32.xlu0 %v683_v55, %s1401_s3  ;;  %v684_v58 = vmul.f32 %v683_v55, %v591_v41 }
 0xc71   :  { %v687_v56 = vpop.permute.xlu0 %686 }
 0xc72   :  { %v689_v57 = vmul.f32 %v687_v56, %v683_v55  ;;  %v1013_v56 = vld [vmem:[%s1691_s4 + $0x18] sm:$0xff] }
 0xc74   :  { %691 = vrot.lane.b32.xlu1 %v689_v57, %s1402_s13  ;;  %v1012_v57 = vld [vmem:[%s1691_s4 + $0x10] sm:$0xff] }
 0xce6   :  { %v692_v59 = vpop.permute.xlu1 %691 }
 0xce7   :  { %v694_v60 = vadd.f32 %v692_v59, %v684_v58  ;;  %v1010_v58 = vld [vmem:[%s1691_s4] sm:$0xff]  ;;  %s1104_s4 = sshll.u32 %s1403_s10, 4  ;;  %s1105_s4 = int_to_ptr.vmem [resolvable:$true] %s1104_s4 }
 0xce8   :  { %s1377_s11 = scalar_lea.vmem %s1105_s4, 128  ;;  %p1382_p1 = scmp.lt.s32.totalorder %s1105_s4, %s1105_s4 }
 0xce9   :  { %1351 = vtanh.f32 %v694_v60  ;;  %p1378_p0 = scmp.ne.s32.totalorder %s1105_s4, %s1377_s11  ;;  %p1383_p2 = scmp.lt.s32.totalorder %s1377_s11, %s1377_s11 }
 0xceb   :  { %p1384_p3 = por %p1383_p2, %p1382_p1 }
 0xced   :  { %p1385_p4 = pnand %p1384_p3, %p1378_p0 }
 0xcf6   :  { %v1352_v62 = vpop.eup %1351 }
 0xcf7   :  { %697 = vrot.lane.b32.xlu0 %v1352_v62, %s1401_s3 }
 0xd69   :  { %v698_v2 = vpop.permute.xlu0 %697 }
 0xd6a   :  { %v700_v4 = vmul.f32 %v698_v2, %v683_v55 }
 0xd6c   :  { %704 = vrot.lane.b32.xlu1 %v700_v4, %s1402_s13  ;;  %v1136_v4 = vld [vmem:[%s1692_s5] ss:$0 sm:$0xff] }
 0xdde   :  { %v705_v6 = vpop.permute.xlu1 %704 }
 0xddf   :  { %1273 = vmatmul.mubr.msk.f32.vlgmr.msra.gmra.mxu1 %vm189_vm5, %v705_v6 }
 0xde0   :  { %1287 = vmatpush3.msra.mxu1 %v1445_v1  ;;  %1294 = vmatprep.mubr.msk.f32.mxu1 %vm1400_vm1, %v1399_v3 }
 0xde1   :  { %1288 = vmatprep.subr.mxu1 %v1399_v3 }
 0xde2   :  { %1289 = vmatpush3.msra.mxu1 %v1458_v5 }
 0xde3   :  { %1290 = vmatprep.subr.mxu1 %v1399_v3 }
 0xde4   :  { %1291 = vmatpush3.msra.mxu1 %v1468_v7 }
 0xde5   :  { %1292 = vmatprep.subr.mxu1 %v1399_v3 }
 0xde6   :  { %1293 = vmatpush3.msra.mxu1 %v1476_v8 }
 0xe9f   :  { %v774_v11 = vpop.f32.mrf.mxu1 }
 0xea0   :  { %v778_v1 = vadd.f32 %v774_v11, %v158_v9 }
 0xea1   :  { %v1274_v12 = vpop.f32.mrf.mxu1 }
 0xea2   :  { %v1131_v13 = vmul.f32 -1.442695, %v778_v1 }
 0xea4   :  { %1353 = vpow2.f32 %v1131_v13 }
 0xea5   :  { %1355 = vtanh.f32 %v778_v1 }
 0xeb1   :  { %v1354_v14 = vpop.eup %1353 }
 0xeb2   :  { %v783_v15 = vadd.f32 1.0, %v1354_v14  ;;  %v1356_v5 = vpop.eup %1355 }
 0xeb4   :  { %1357 = vrcp.f32 %v783_v15 }
 0xec1   :  { %v1358_v16 = vpop.eup %1357 }
 0xec2   :  { %v786_v7 = vsel %vm1510_vm4, %v1356_v5, %v1358_v16 }
 0xec3   :  { %789 = vrot.lane.b32.xlu0 %v786_v7, %s1401_s3  ;;  %v787_v61 = vmul.f32 %v786_v7, %v694_v60 }
 0xf35   :  { %v790_v8 = vpop.permute.xlu0 %789 }
 0xf36   :  { %v792_v17 = vmul.f32 %v790_v8, %v786_v7 }
 0xf38   :  { %794 = vrot.lane.b32.xlu1 %v792_v17, %s1402_s13 }
 0xfaa   :  { %v795_v18 = vpop.permute.xlu1 %794 }
 0xfab   :  { %v797_v19 = vadd.f32 %v795_v18, %v787_v61 }
 0xfad   :  { %1359 = vtanh.f32 %v797_v19 }
 0xfba   :  { %v1360_v20 = vpop.eup %1359 }
 0xfbb   :  { %800 = vrot.lane.b32.xlu0 %v1360_v20, %s1401_s3 }
0x102d   :  { %v801_v22 = vpop.permute.xlu0 %800 }
0x102e   :  { %v803_v23 = vmul.f32 %v801_v22, %v786_v7 }
0x1030   :  { %807 = vrot.lane.b32.xlu1 %v803_v23, %s1402_s13 }
0x10a2   :  { %v808_v24 = vpop.permute.xlu1 %807 }
0x10a3   :  { %1284 = vmatmul.mubr.msk.f32.vlgmr.msra.gmra.mxu0 %vm189_vm5, %v808_v24 }
0x10a4   :  { %1305 = vmatprep.mubr.msk.f32.mxu0 %vm1400_vm1, %v1399_v3  ;;  %1298 = vmatpush3.msra.mxu0 %v1013_v56 }
0x10a5   :  { %1299 = vmatprep.subr.mxu0 %v1399_v3 }
0x10a6   :  { %1300 = vmatpush3.msra.mxu0 %v1012_v57 }
0x10a7   :  { %1301 = vmatprep.subr.mxu0 %v1399_v3 }
0x10a8   :  { %1302 = vmatpush3.msra.mxu0 %v1011_v21 }
0x10a9   :  { %1303 = vmatprep.subr.mxu0 %v1399_v3 }
0x10aa   :  { %1304 = vmatpush3.msra.mxu0 %v1010_v58 }
0x1163   :  { %v877_v26 = vpop.f32.mrf.mxu0 }
0x1164   :  { %v881_v27 = vadd.f32 %v877_v26, %v163_v25 }
0x1165   :  { %v1285_v28 = vpop.f32.mrf.mxu0 }
0x1166   :  { %v1133_v29 = vmul.f32 -1.442695, %v881_v27 }
0x1168   :  { %1361 = vpow2.f32 %v1133_v29 }
0x1169   :  { %1363 = vtanh.f32 %v881_v27 }
0x1175   :  { %v1362_v30 = vpop.eup %1361 }
0x1176   :  { %v886_v31 = vadd.f32 1.0, %v1362_v30  ;;  %v1364_v32 = vpop.eup %1363 }
0x1178   :  { %1365 = vrcp.f32 %v886_v31 }
0x1185   :  { %v1366_v33 = vpop.eup %1365 }
0x1186   :  { %v889_v34 = vsel %vm1510_vm4, %v1364_v32, %v1366_v33 }
0x1187   :  { %892 = vrot.lane.b32.xlu0 %v889_v34, %s1401_s3  ;;  %v890_v0 = vmul.f32 %v889_v34, %v797_v19 }
0x11f9   :  { %v893_v35 = vpop.permute.xlu0 %892 }
0x11fa   :  { %v895_v36 = vmul.f32 %v893_v35, %v889_v34 }
0x11fc   :  { %897 = vrot.lane.b32.xlu1 %v895_v36, %s1402_s13 }
0x126e   :  { %v898_v37 = vpop.permute.xlu1 %897 }
0x126f   :  { %v900_v38 = vadd.f32 %v898_v37, %v890_v0 }
0x1271   :  { %1367 = vtanh.f32 %v900_v38 }
0x127e   :  { %v1368_v39 = vpop.eup %1367 }
0x127f   :  { %903 = vrot.lane.b32.xlu0 %v1368_v39, %s1401_s3 }
0x12f1   :  { %v904_v40 = vpop.permute.xlu0 %903 }
0x12f2   :  { %v906_v41 = vmul.f32 %v904_v40, %v889_v34 }
0x12f4   :  { %910 = vrot.lane.b32.xlu1 %v906_v41, %s1402_s13 }
0x1366   :  { %v911_v42 = vpop.permute.xlu1 %910 }
0x1367   :  { %1295 = vmatmul.mubr.msk.f32.vlgmr.msra.gmra.mxu1 %vm189_vm5, %v911_v42 }
0x1427   :  { %v980_v44 = vpop.f32.mrf.mxu1 }
0x1428   :  { %v984_v45 = vadd.f32 %v980_v44, %v168_v43 }
0x1429   :  { %v1296_v46 = vpop.f32.mrf.mxu1 }
0x142a   :  { %v1135_v47 = vmul.f32 -1.442695, %v984_v45 }
0x142c   :  { %1369 = vpow2.f32 %v1135_v47 }
0x142d   :  { %1371 = vtanh.f32 %v984_v45 }
0x1439   :  { %v1370_v48 = vpop.eup %1369 }
0x143a   :  { %v989_v49 = vadd.f32 1.0, %v1370_v48  ;;  %v1372_v50 = vpop.eup %1371 }
0x143c   :  { %1373 = vrcp.f32 %v989_v49 }
0x1449   :  { %v1374_v51 = vpop.eup %1373 }
0x144a   :  { %v992_v52 = vsel %vm1510_vm4, %v1372_v50, %v1374_v51 }
0x144b   :  { %995 = vrot.lane.b32.xlu0 %v992_v52, %s1401_s3  ;;  %v993_v10 = vmul.f32 %v992_v52, %v900_v38 }
0x14bd   :  { %v996_v53 = vpop.permute.xlu0 %995 }
0x14be   :  { %v998_v54 = vmul.f32 %v996_v53, %v992_v52 }
0x14c0   :  { %1000 = vrot.lane.b32.xlu1 %v998_v54, %s1402_s13 }
0x1532   :  { %v1001_v63 = vpop.permute.xlu1 %1000 }
0x1533   :  { %v1003_v55 = vadd.f32 %v1001_v63, %v993_v10 }
0x1535   :  { %1375 = vtanh.f32 %v1003_v55 }
0x1542   :  { %v1376_v59 = vpop.eup %1375 }
0x1543   :  { %1006 = vrot.lane.b32.xlu0 %v1376_v59, %s1401_s3 }
0x15b5   :  { %v1007_v60 = vpop.permute.xlu0 %1006 }
0x15b6   :  { %v1009_v62 = vmul.f32 %v1007_v60, %v992_v52 }
0x15b8   :  { %1022 = vrot.lane.b32.xlu1 %v1009_v62, %s1402_s13 }
0x162a   :  { %v1023_v2 = vpop.permute.xlu1 %1022 }
0x162b   :  { %1306 = vmatmul.mubr.msk.f32.vlgmr.msra.gmra.mxu0 %vm189_vm5, %v1023_v2 }
0x16eb   :  { %v1092_v6 = vpop.f32.mrf.mxu0 }
0x16ec   :  { %v1093_v3 = vadd.f32 %v1136_v4, %v1092_v6 }
0x16ed   :  { %v1307_v9 = vpop.f32.mrf.mxu0 }
0x16ee   :  { %1097 = vst.msk [vmem:[#allocation3] sm:$0xff] %vm1096_vm6, %v1093_v3 }
0x16ef   :  { %1388 = shalt.err (!%p1385_p4)
}
0x16f0   :  { %1107 = dma.vmem_to_hbm [thread:$0]  %s1105_s4, 128, %s1693_s6, [#allocation4]  }
0x16f1   :  { %1397 = dma.done.wait [#allocation4], 128  }
0x16f2   :  { %1398 = vsyncadd [#allocation4], 4294967168 }
0x16f3   :  { %1111 = vsyncpa [#allocation4], 1 }

</bundles_post_ra>
